<compile_context>
chip_gen: v6e
topology: v6e:2x2x1
jax: 0.10.0
libtpu: 0.0.40
codegen_flags: <defaults>
</compile_context>

<pallas_src>
import functools

import numpy as np

import jax
import jax.numpy as jnp
from jax.experimental import pallas as pl
from jax.experimental.pallas import tpu as pltpu


# --------------------------------- kernel --------------------------------------
def _patch_merging_kernel(x_ref, g_ref, b_ref, w_ref, o_ref, *, eps):
    # x_ref: (BT, H2, 2, W2, 2C) — one contiguous block; axis 2 is row parity,
    #        the 2C lane axis packs (col-parity, channel).
    # g/b  : (1, 4C) permuted LayerNorm affine.   w: (4C, 2C) permuted weight.
    # o_ref: (BT, H2*W2, 2C).
    x = x_ref[...].astype(jnp.float32)
    bt, h2, _, w2, c2 = x.shape                         # c2 = 2C
    c4 = 2 * c2                                         # 4C

    xe = x[:, :, 0]                                     # (BT, H2, W2, 2C) even rows
    xo = x[:, :, 1]                                     # (BT, H2, W2, 2C) odd rows
    m = jnp.concatenate([xe, xo], axis=-1)              # (BT, H2, W2, 4C) lane concat
    m = m.reshape(bt * h2 * w2, c4)                     # (tokens, 4C) — lane-dense K

    # LayerNorm over merged 4C features (f32 math; eps = torch default).
    mean = jnp.mean(m, axis=-1, keepdims=True)
    d = m - mean
    var = jnp.mean(d * d, axis=-1, keepdims=True)
    y = d * jax.lax.rsqrt(var + eps)
    y = y * g_ref[...].astype(jnp.float32) + b_ref[...].astype(jnp.float32)

    # 4C -> 2C reduction (bias=False).  bf16 operands + f32 accumulation when
    # the model dtype is bf16 (fast MXU path on v6e/v7x); f32 otherwise.
    dot_dt = jnp.bfloat16 if o_ref.dtype == jnp.bfloat16 else jnp.float32
    out = jnp.dot(y.astype(dot_dt), w_ref[...].astype(dot_dt),
                  preferred_element_type=jnp.float32)   # (tokens, 2C)
    o_ref[...] = out.reshape(bt, h2 * w2, c2).astype(o_ref.dtype)


# ------------------------- one-time parameter prep ------------------------------
def prepare_patch_merging_params(norm_gamma, norm_beta, red_weight):
    """Hoisted out of the forward: permute LN affine + reduction-weight rows so
    the kernel's (row-parity, col-parity, channel) feature order reproduces
    PyTorch's cat([x0, x1, x2, x3]) exactly (LN stats are permutation-invariant).

    norm_gamma/norm_beta: (4C,);  red_weight: (2C, 4C) nn.Linear layout.
    Returns g_k:(1,4C), b_k:(1,4C), w_k:(4C,2C).
    """
    c4 = norm_gamma.shape[0]
    C = c4 // 4
    # kernel feature index j = r*2C + s*C + c  ->  torch index i = s*2C + r*C + c
    perm = np.asarray(
        [s * 2 * C + r * C + c for r in range(2) for s in range(2) for c in range(C)],
        dtype=np.int32)
    g_k = jnp.asarray(norm_gamma)[perm].reshape(1, c4)
    b_k = jnp.asarray(norm_beta)[perm].reshape(1, c4)
    w_k = jnp.asarray(red_weight).T[perm, :]            # (4C, 2C), rows permuted
    return g_k, b_k, w_k


# --------------------------------- wrapper --------------------------------------
def patch_merging_forward(x, H, W, g_k, b_k, w_k, *, eps=1e-5, batch_tile=None):
    """PatchMerging.forward with pre-permuted params (see prepare_*).

    x: (B, H*W, C).  Returns (B, ceil(H/2)*ceil(W/2), 2C).
    """
    B, L, C = x.shape
    assert L == H * W, "input feature has wrong size"

    xv = x.reshape(B, H, W, C)
    if H % 2 == 1 or W % 2 == 1:                        # == F.pad(x,(0,0,0,W%2,0,H%2))
        xv = jnp.pad(xv, ((0, 0), (0, H % 2), (0, W % 2), (0, 0)))
        H, W = H + H % 2, W + W % 2
    H2, W2 = H // 2, W // 2

    # Row-major view (B, H2, row-parity, W2, 2C); pure reshape, no data movement.
    x5 = xv.reshape(B, H2, 2, W2, 2 * C)

    # Batch-packed tiling: largest divisor of B whose double-buffered working
    # set stays well under VMEM on every generation (v7x has only 64 MiB).
    if batch_tile is None:
        per_batch = (H2 * 2 * W2 * 2 * C + H2 * W2 * 2 * C) * 4 * 2  # in+out, 2 bufs, f32
        budget = 8 * 1024 * 1024
        bt = max(1, min(B, budget // max(per_batch, 1)))
        while B % bt:
            bt -= 1
        batch_tile = bt
    n_steps = B // batch_tile

    tokens = B * H2 * W2
    itemsize = jnp.dtype(x.dtype).itemsize
    cost = pl.CostEstimate(
        flops=2 * tokens * (4 * C) * (2 * C) + 8 * tokens * (4 * C),
        transcendentals=tokens,                          # rsqrt per token
        bytes_accessed=(x5.size + tokens * 2 * C) * itemsize
                       + (4 * C * 2 * C + 8 * C) * 4,
    )

    return pl.pallas_call(
        functools.partial(_patch_merging_kernel, eps=eps),
        out_shape=jax.ShapeDtypeStruct((B, H2 * W2, 2 * C), x.dtype),
        grid=(n_steps,),
        in_specs=[
            # single contiguous block covering both row parities per batch tile
            pl.BlockSpec((batch_tile, H2, 2, W2, 2 * C), lambda i: (i, 0, 0, 0, 0)),
            pl.BlockSpec((1, 4 * C), lambda i: (0, 0)),
            pl.BlockSpec((1, 4 * C), lambda i: (0, 0)),
            pl.BlockSpec((4 * C, 2 * C), lambda i: (0, 0)),
        ],
        out_specs=pl.BlockSpec((batch_tile, H2 * W2, 2 * C), lambda i: (i, 0, 0)),
        compiler_params=pltpu.CompilerParams(
            # single step for the test size; shards batch tiles across v7x's
            # two TensorCores when n_steps > 1 with real per-step work.
            dimension_semantics=("parallel",)),
        cost_estimate=cost,
    )(x5, g_k, b_k, w_k)


# --------------------------- pure-JAX reference ----------------------------------
def patch_merging_reference(x, H, W, gamma, beta, weight, *, eps=1e-5):
    """Direct transcription of the PyTorch forward (for correctness check)."""
    B, L, C = x.shape
    xv = x.reshape(B, H, W, C)
    if H % 2 == 1 or W % 2 == 1:
        xv = jnp.pad(xv, ((0, 0), (0, H % 2), (0, W % 2), (0, 0)))
    x0 = xv[:, 0::2, 0::2, :]
    x1 = xv[:, 1::2, 0::2, :]
    x2 = xv[:, 0::2, 1::2, :]
    x3 = xv[:, 1::2, 1::2, :]
    xc = jnp.concatenate([x0, x1, x2, x3], axis=-1).reshape(B, -1, 4 * C)
    mu = jnp.mean(xc, axis=-1, keepdims=True)
    var = jnp.mean((xc - mu) ** 2, axis=-1, keepdims=True)
    xn = (xc - mu) / jnp.sqrt(var + eps) * gamma + beta
    return xn @ weight.T


# ----------------------------------- main -----------------------------------------
if __name__ == "__main__":
    B, H, W, C = 2, 16, 16, 32                          # L = 256, 4C = 128, 2C = 64
    key = jax.random.PRNGKey(0)
    kx, kg, kb, kw = jax.random.split(key, 4)
    x = jax.random.normal(kx, (B, H * W, C), jnp.float32)
    gamma = 1.0 + 0.05 * jax.random.normal(kg, (4 * C,), jnp.float32)
    beta = 0.02 * jax.random.normal(kb, (4 * C,), jnp.float32)
    weight = 0.05 * jax.random.normal(kw, (2 * C, 4 * C), jnp.float32)  # (2C, 4C)

    # one-time (module-init) parameter permutation, hoisted out of the forward
    g_k, b_k, w_k = prepare_patch_merging_params(gamma, beta, weight)

    fwd = jax.jit(functools.partial(patch_merging_forward, H=H, W=W))
    out = fwd(x, g_k=g_k, b_k=b_k, w_k=w_k)
    jax.block_until_ready(out)

    ref = patch_merging_reference(x, H, W, gamma, beta, weight)
    assert out.shape == (B, (H // 2) * (W // 2), 2 * C)
    assert bool(jnp.all(jnp.isfinite(out)))
    assert bool(jnp.allclose(out, ref, atol=1e-3, rtol=1e-3)), \
        float(jnp.max(jnp.abs(out - ref)))
    print("KERNEL_OK")
</pallas_src>

<mosaic_0001>
module attributes {stable_mosaic.version = 11 : i64} {
  func.func @_patch_merging_kernel(%arg0: i32, %arg1: memref<2x8x2x8x64xf32, #tpu.memory_space<vmem>>, %arg2: memref<1x128xf32, #tpu.memory_space<vmem>>, %arg3: memref<1x128xf32, #tpu.memory_space<vmem>>, %arg4: memref<128x64xf32, #tpu.memory_space<vmem>>, %arg5: memref<2x64x64xf32, #tpu.memory_space<vmem>>) attributes {dimension_semantics = [#tpu.dimension_semantics<parallel>], iteration_bounds = array<i64: 1>, scalar_prefetch = 0 : i64, scratch_operands = 0 : i64, tpu.core_type = #tpu.core_type<tc>, window_params = [{transform_indices = @transform_0, window_bounds = array<i64: 2, 8, 2, 8, 64>}, {pipeline_mode = #tpu.pipeline_mode<synchronous>, transform_indices = @transform_1, window_bounds = array<i64: 1, 128>}, {pipeline_mode = #tpu.pipeline_mode<synchronous>, transform_indices = @transform_2, window_bounds = array<i64: 1, 128>}, {pipeline_mode = #tpu.pipeline_mode<synchronous>, transform_indices = @transform_3, window_bounds = array<i64: 128, 64>}, {transform_indices = @transform_4, window_bounds = array<i64: 2, 64, 64>}]} {
    %c0 = arith.constant 0 : index
    %c0_0 = arith.constant 0 : index
    %c0_1 = arith.constant 0 : index
    %c0_2 = arith.constant 0 : index
    %c0_3 = arith.constant 0 : index
    %0 = vector.load %arg1[%c0, %c0_0, %c0_1, %c0_2, %c0_3] : memref<2x8x2x8x64xf32, #tpu.memory_space<vmem>>, vector<2x8x2x8x64xf32>
    %1 = vector.extract_strided_slice %0 {offsets = [0, 0, 0, 0, 0], sizes = [2, 8, 1, 8, 64], strides = [1, 1, 1, 1, 1]} : vector<2x8x2x8x64xf32> to vector<2x8x1x8x64xf32>
    %2 = vector.shape_cast %1 : vector<2x8x1x8x64xf32> to vector<2x8x8x64xf32>
    %3 = vector.extract_strided_slice %0 {offsets = [0, 0, 1, 0, 0], sizes = [2, 8, 1, 8, 64], strides = [1, 1, 1, 1, 1]} : vector<2x8x2x8x64xf32> to vector<2x8x1x8x64xf32>
    %4 = vector.shape_cast %3 : vector<2x8x1x8x64xf32> to vector<2x8x8x64xf32>
    %5 = tpu.concatenate %2, %4 in 3 : vector<2x8x8x64xf32>, vector<2x8x8x64xf32> -> vector<2x8x8x128xf32>
    %6 = vector.shape_cast %5 : vector<2x8x8x128xf32> to vector<128x128xf32>
    %cst = arith.constant dense<0.000000e+00> : vector<128xf32>
    %7 = vector.multi_reduction <add>, %6, %cst [1] : vector<128x128xf32> to vector<128xf32>
    %8 = vector.shape_cast %7 : vector<128xf32> to vector<128x1xf32>
    %cst_4 = arith.constant 1.280000e+02 : f32
    %9 = vector.broadcast %cst_4 : f32 to vector<128x1xf32>
    %10 = arith.divf %8, %9 : vector<128x1xf32>
    %11 = vector.broadcast %10 : vector<128x1xf32> to vector<128x128xf32>
    %12 = arith.subf %6, %11 : vector<128x128xf32>
    %13 = arith.mulf %12, %12 : vector<128x128xf32>
    %cst_5 = arith.constant dense<0.000000e+00> : vector<128xf32>
    %14 = vector.multi_reduction <add>, %13, %cst_5 [1] : vector<128x128xf32> to vector<128xf32>
    %15 = vector.shape_cast %14 : vector<128xf32> to vector<128x1xf32>
    %cst_6 = arith.constant 1.280000e+02 : f32
    %16 = vector.broadcast %cst_6 : f32 to vector<128x1xf32>
    %17 = arith.divf %15, %16 : vector<128x1xf32>
    %cst_7 = arith.constant 9.99999974E-6 : f32
    %18 = vector.broadcast %cst_7 : f32 to vector<128x1xf32>
    %19 = arith.addf %17, %18 : vector<128x1xf32>
    %20 = math.rsqrt %19 : vector<128x1xf32>
    %21 = vector.broadcast %20 : vector<128x1xf32> to vector<128x128xf32>
    %22 = arith.mulf %12, %21 : vector<128x128xf32>
    %c0_8 = arith.constant 0 : index
    %c0_9 = arith.constant 0 : index
    %23 = vector.load %arg2[%c0_8, %c0_9] : memref<1x128xf32, #tpu.memory_space<vmem>>, vector<1x128xf32>
    %24 = vector.broadcast %23 : vector<1x128xf32> to vector<128x128xf32>
    %25 = arith.mulf %22, %24 : vector<128x128xf32>
    %c0_10 = arith.constant 0 : index
    %c0_11 = arith.constant 0 : index
    %26 = vector.load %arg3[%c0_10, %c0_11] : memref<1x128xf32, #tpu.memory_space<vmem>>, vector<1x128xf32>
    %27 = vector.broadcast %26 : vector<1x128xf32> to vector<128x128xf32>
    %28 = arith.addf %25, %27 : vector<128x128xf32>
    %c0_12 = arith.constant 0 : index
    %c0_13 = arith.constant 0 : index
    %29 = vector.load %arg4[%c0_12, %c0_13] : memref<128x64xf32, #tpu.memory_space<vmem>>, vector<128x64xf32>
    %cst_14 = arith.constant dense<0.000000e+00> : vector<128x64xf32>
    %30 = tpu.matmul %28, %29, %cst_14 {dimension_numbers = #tpu.dot_dimension_numbers<[1], [0], [0], [1], [0, 0, 1, 1], [], []>} : vector<128x128xf32>, vector<128x64xf32>, vector<128x64xf32> -> vector<128x64xf32>
    %31 = vector.shape_cast %30 : vector<128x64xf32> to vector<2x64x64xf32>
    %c0_15 = arith.constant 0 : index
    %c0_16 = arith.constant 0 : index
    %c0_17 = arith.constant 0 : index
    %32 = vector.load %arg5[%c0_15, %c0_16, %c0_17] : memref<2x64x64xf32, #tpu.memory_space<vmem>>, vector<2x64x64xf32>
    tpu.vector_store %arg5[%c0_15, %c0_16, %c0_17], %31 {strides = array<i32>} : memref<2x64x64xf32, #tpu.memory_space<vmem>>, vector<2x64x64xf32>,
    return
  }
  func.func @transform_0(%arg0: i32) -> (i32, i32, i32, i32, i32) {
    %c0_i32 = arith.constant 0 : i32
    %c0_i32_0 = arith.constant 0 : i32
    %c0_i32_1 = arith.constant 0 : i32
    %c0_i32_2 = arith.constant 0 : i32
    %c0_i32_3 = arith.constant 0 : i32
    return %arg0, %c0_i32, %c0_i32_0, %c0_i32_1, %c0_i32_2 : i32, i32, i32, i32, i32
  }
  func.func @transform_1(%arg0: i32) -> (i32, i32) {
    %c0_i32 = arith.constant 0 : i32
    %c0_i32_0 = arith.constant 0 : i32
    %c0_i32_1 = arith.constant 0 : i32
    return %c0_i32, %c0_i32_0 : i32, i32
  }
  func.func @transform_2(%arg0: i32) -> (i32, i32) {
    %c0_i32 = arith.constant 0 : i32
    %c0_i32_0 = arith.constant 0 : i32
    %c0_i32_1 = arith.constant 0 : i32
    return %c0_i32, %c0_i32_0 : i32, i32
  }
  func.func @transform_3(%arg0: i32) -> (i32, i32) {
    %c0_i32 = arith.constant 0 : i32
    %c0_i32_0 = arith.constant 0 : i32
    %c0_i32_1 = arith.constant 0 : i32
    return %c0_i32, %c0_i32_0 : i32, i32
  }
  func.func @transform_4(%arg0: i32) -> (i32, i32, i32) {
    %c0_i32 = arith.constant 0 : i32
    %c0_i32_0 = arith.constant 0 : i32
    %c0_i32_1 = arith.constant 0 : i32
    return %arg0, %c0_i32, %c0_i32_0 : i32, i32, i32
  }
}

</mosaic_0001>

<bundles_post_ra>
// kernel: patch_merging_forward.1
= control target key start
LH: loop header
LB: loop body
LE: loop exit
PB: predicated region body
PF: predicated region fallthrough
CT: control target
= control target key end

     0   :  { %s727_s19 = smov 64   ;;  %s1137_s0 = inlined_call_operand.vmem [shape: f32[2,8,2,8,64], index: 0, kind: input, shape index: {}]   ;;  %s1138_s1 = inlined_call_operand.vmem [shape: f32[1,128], index: 1, kind: input, shape index: {}]   ;;  %s1139_s2 = inlined_call_operand.vmem [shape: f32[1,128], index: 2, kind: input, shape index: {}]   ;;  %s1140_s3 = inlined_call_operand.vmem [shape: f32[128,64], index: 3, kind: input, shape index: {}]   ;;  %s1141_s4 = inlined_call_operand.hbm [shape: f32[2,64,64], index: 4, kind: output, shape index: {}]  }
   0x1   :  { %v19_v0 = vld [vmem:[%s1137_s0 + $0x8] sm:$0xff]  ;;  %v21_v1 = vld [vmem:[%s1137_s0 + $0x18] sm:$0xff] }
   0x2   :  { %66 = vrot.lane.b32.xlu0 %v19_v0, %s727_s19  ;;  %68 = vrot.lane.b32.xlu1 %v21_v1, %s727_s19  ;;  %v35_v2 = vld [vmem:[%s1137_s0 + $0x88] sm:$0xff]  ;;  %v37_v3 = vld [vmem:[%s1137_s0 + $0x98] sm:$0xff] }
   0x3   :  { %v23_v4 = vld [vmem:[%s1137_s0 + $0x28] sm:$0xff]  ;;  %v25_v6 = vld [vmem:[%s1137_s0 + $0x38] sm:$0xff] }
   0x4   :  { %v39_v5 = vld [vmem:[%s1137_s0 + $0xa8] sm:$0xff]  ;;  %v41_v7 = vld [vmem:[%s1137_s0 + $0xb8] sm:$0xff] }
   0x6   :  { %82 = vrot.lane.b32.xlu0 %v35_v2, %s727_s19  ;;  %84 = vrot.lane.b32.xlu1 %v37_v3, %s727_s19 }
   0xa   :  { %70 = vrot.lane.b32.xlu0 %v23_v4, %s727_s19  ;;  %86 = vrot.lane.b32.xlu1 %v39_v5, %s727_s19 }
   0xb   :  { %9 = vsyncpa [#allocation3], 0  ;;  %v27_v8 = vld [vmem:[%s1137_s0 + $0x48] sm:$0xff]  ;;  %v29_v10 = vld [vmem:[%s1137_s0 + $0x58] sm:$0xff]  ;;  %vm114_vm0 = vcmask 523264  }
   0xc   :  { %v43_v9 = vld [vmem:[%s1137_s0 + $0xc8] sm:$0xff]  ;;  %v45_v11 = vld [vmem:[%s1137_s0 + $0xd8] sm:$0xff]  ;;  %v18_v16 = vld [vmem:[%s1137_s0] sm:$0xff] }
   0xd   :  { %v31_v12 = vld [vmem:[%s1137_s0 + $0x68] sm:$0xff]  ;;  %v33_v14 = vld [vmem:[%s1137_s0 + $0x78] sm:$0xff]  ;;  %v20_v19 = vld [vmem:[%s1137_s0 + $0x10] sm:$0xff] }
   0xe   :  { %72 = vrot.lane.b32.xlu0 %v25_v6, %s727_s19  ;;  %88 = vrot.lane.b32.xlu1 %v41_v7, %s727_s19  ;;  %v47_v13 = vld [vmem:[%s1137_s0 + $0xe8] sm:$0xff]  ;;  %v49_v15 = vld [vmem:[%s1137_s0 + $0xf8] sm:$0xff] }
   0xf   :  { %v34_v21 = vld [vmem:[%s1137_s0 + $0x80] sm:$0xff]  ;;  %v36_v25 = vld [vmem:[%s1137_s0 + $0x90] sm:$0xff]  ;;  %v369_v0 = vld [vmem:[%s1140_s3 + $0x78] sm:$0xff] }
  0x10   :  { %v22_v27 = vld [vmem:[%s1137_s0 + $0x20] sm:$0xff]  ;;  %v24_v33 = vld [vmem:[%s1137_s0 + $0x30] sm:$0xff]  ;;  %581 = vmatprep.subr.mxu0 %v369_v0  ;;  %637 = vmatprep.subr.mxu1 %v369_v0 }
  0x11   :  { %v38_v31 = vld [vmem:[%s1137_s0 + $0xa0] sm:$0xff]  ;;  %v40_v37 = vld [vmem:[%s1137_s0 + $0xb0] sm:$0xff]  ;;  %582 = vmatpush3.msra.mxu0 %v369_v0  ;;  %653 = vmatpush3.msra.mxu1 %v369_v0 }
  0x12   :  { %74 = vrot.lane.b32.xlu0 %v27_v8, %s727_s19  ;;  %90 = vrot.lane.b32.xlu1 %v43_v9, %s727_s19  ;;  %v26_v39 = vld [vmem:[%s1137_s0 + $0x40] sm:$0xff]  ;;  %v28_v45 = vld [vmem:[%s1137_s0 + $0x50] sm:$0xff] }
  0x13   :  { %v42_v43 = vld [vmem:[%s1137_s0 + $0xc0] sm:$0xff]  ;;  %v44_v49 = vld [vmem:[%s1137_s0 + $0xd0] sm:$0xff] }
  0x14   :  { %v30_v51 = vld [vmem:[%s1137_s0 + $0x60] sm:$0xff]  ;;  %v32_v57 = vld [vmem:[%s1137_s0 + $0x70] sm:$0xff] }
  0x15   :  { %v46_v55 = vld [vmem:[%s1137_s0 + $0xe0] sm:$0xff]  ;;  %v48_v61 = vld [vmem:[%s1137_s0 + $0xf0] sm:$0xff] }
  0x16   :  { %76 = vrot.lane.b32.xlu0 %v29_v10, %s727_s19  ;;  %92 = vrot.lane.b32.xlu1 %v45_v11, %s727_s19  ;;  %v368_v1 = vld [vmem:[%s1140_s3 + $0x70] sm:$0xff] }
  0x17   :  { %583 = vmatprep.subr.mxu0 %v368_v1  ;;  %638 = vmatprep.subr.mxu1 %v368_v1 }
  0x18   :  { %584 = vmatpush3.msra.mxu0 %v368_v1  ;;  %654 = vmatpush3.msra.mxu1 %v368_v1 }
  0x1a   :  { %78 = vrot.lane.b32.xlu0 %v31_v12, %s727_s19  ;;  %94 = vrot.lane.b32.xlu1 %v47_v13, %s727_s19 }
  0x1e   :  { %80 = vrot.lane.b32.xlu0 %v33_v14, %s727_s19  ;;  %96 = vrot.lane.b32.xlu1 %v49_v15, %s727_s19 }
  0x74   :  { %v67_v17 = vpop.permute.xlu0 %66  ;;  %v69_v18 = vpop.permute.xlu1 %68 }
  0x75   :  { %v827_v20 = vsel %vm114_vm0, %v18_v16, %v67_v17  ;;  %v834_v22 = vsel %vm114_vm0, %v20_v19, %v69_v18 }
  0x76   :  { %131 = vadd.xlane.f32.xlu0 %v827_v20 }
  0x78   :  { %v83_v23 = vpop.permute.xlu0 %82  ;;  %v85_v24 = vpop.permute.xlu1 %84 }
  0x79   :  { %v840_v26 = vsel %vm114_vm0, %v34_v21, %v83_v23  ;;  %v848_v28 = vsel %vm114_vm0, %v36_v25, %v85_v24 }
  0x7a   :  { %147 = vadd.xlane.f32.xlu1 %v840_v26  ;;  %133 = vadd.xlane.f32.xlu0 %v834_v22 }
  0x7c   :  { %v71_v29 = vpop.permute.xlu0 %70  ;;  %v87_v30 = vpop.permute.xlu1 %86 }
  0x7d   :  { %v854_v32 = vsel %vm114_vm0, %v22_v27, %v71_v29  ;;  %v862_v34 = vsel %vm114_vm0, %v38_v31, %v87_v30  ;;  %v367_v30 = vld [vmem:[%s1140_s3 + $0x68] sm:$0xff] }
  0x7e   :  { %135 = vadd.xlane.f32.xlu1 %v854_v32  ;;  %149 = vadd.xlane.f32.xlu0 %v848_v28 }
  0x7f   :  { %585 = vmatprep.subr.mxu0 %v367_v30  ;;  %639 = vmatprep.subr.mxu1 %v367_v30 }
  0x80   :  { %v73_v35 = vpop.permute.xlu0 %72  ;;  %v89_v36 = vpop.permute.xlu1 %88  ;;  %586 = vmatpush3.msra.mxu0 %v367_v30  ;;  %655 = vmatpush3.msra.mxu1 %v367_v30 }
  0x81   :  { %v868_v38 = vsel %vm114_vm0, %v24_v33, %v73_v35  ;;  %v876_v40 = vsel %vm114_vm0, %v40_v37, %v89_v36 }
  0x82   :  { %137 = vadd.xlane.f32.xlu1 %v868_v38  ;;  %151 = vadd.xlane.f32.xlu0 %v862_v34 }
  0x84   :  { %v75_v41 = vpop.permute.xlu0 %74  ;;  %v91_v42 = vpop.permute.xlu1 %90 }
  0x85   :  { %v882_v44 = vsel %vm114_vm0, %v26_v39, %v75_v41  ;;  %v890_v46 = vsel %vm114_vm0, %v42_v43, %v91_v42 }
  0x86   :  { %139 = vadd.xlane.f32.xlu1 %v882_v44  ;;  %153 = vadd.xlane.f32.xlu0 %v876_v40 }
  0x88   :  { %v77_v47 = vpop.permute.xlu0 %76  ;;  %v93_v48 = vpop.permute.xlu1 %92 }
  0x89   :  { %v896_v50 = vsel %vm114_vm0, %v28_v45, %v77_v47  ;;  %v904_v52 = vsel %vm114_vm0, %v44_v49, %v93_v48  ;;  %v364_v48 = vld [vmem:[%s1140_s3 + $0x50] sm:$0xff] }
  0x8a   :  { %141 = vadd.xlane.f32.xlu1 %v896_v50  ;;  %155 = vadd.xlane.f32.xlu0 %v890_v46 }
  0x8c   :  { %v79_v53 = vpop.permute.xlu0 %78  ;;  %v95_v54 = vpop.permute.xlu1 %94 }
  0x8d   :  { %v910_v56 = vsel %vm114_vm0, %v30_v51, %v79_v53  ;;  %v918_v58 = vsel %vm114_vm0, %v46_v55, %v95_v54 }
  0x8e   :  { %143 = vadd.xlane.f32.xlu1 %v910_v56  ;;  %157 = vadd.xlane.f32.xlu0 %v904_v52 }
  0x90   :  { %v81_v59 = vpop.permute.xlu0 %80  ;;  %v97_v60 = vpop.permute.xlu1 %96 }
  0x91   :  { %v924_v62 = vsel %vm114_vm0, %v32_v57, %v81_v59  ;;  %v929_v63 = vsel %vm114_vm0, %v48_v61, %v97_v60  ;;  %v362_v60 = vld [vmem:[%s1140_s3 + $0x40] sm:$0xff] }
  0x92   :  { %145 = vadd.xlane.f32.xlu1 %v924_v62  ;;  %159 = vadd.xlane.f32.xlu0 %v918_v58 }
  0x96   :  { %161 = vadd.xlane.f32.xlu0 %v929_v63 }
  0xff   :  { %v132_v2 = vpop.xlane.xlu0 %131 }
 0x100   :  { %v164_v3 = vmul.f32 0.0078125, %v132_v2 }
 0x102   :  { %v939_v4 = vsub.f32 %v827_v20, %v164_v3 }
 0x103   :  { %v148_v5 = vpop.xlane.xlu1 %147  ;;  %v134_v6 = vpop.xlane.xlu0 %133 }
 0x104   :  { %v172_v7 = vmul.f32 0.0078125, %v148_v5  ;;  %v165_v8 = vmul.f32 0.0078125, %v134_v6  ;;  %v196_v9 = vmul.f32 %v939_v4, %v939_v4 }
 0x106   :  { %v944_v10 = vsub.f32 %v840_v26, %v172_v7  ;;  %v947_v11 = vsub.f32 %v834_v22, %v165_v8  ;;  %212 = vadd.xlane.f32.xlu1 %v196_v9 }
 0x107   :  { %v136_v12 = vpop.xlane.xlu1 %135  ;;  %v150_v13 = vpop.xlane.xlu0 %149 }
 0x108   :  { %v166_v14 = vmul.f32 0.0078125, %v136_v12  ;;  %v173_v15 = vmul.f32 0.0078125, %v150_v13  ;;  %v204_v16 = vmul.f32 %v944_v10, %v944_v10  ;;  %v197_v17 = vmul.f32 %v947_v11, %v947_v11  ;;  %v359_v13 = vld [vmem:[%s1140_s3 + $0x28] sm:$0xff] }
 0x10a   :  { %v954_v18 = vsub.f32 %v854_v32, %v166_v14  ;;  %v957_v19 = vsub.f32 %v848_v28, %v173_v15  ;;  %228 = vadd.xlane.f32.xlu0 %v204_v16  ;;  %214 = vadd.xlane.f32.xlu1 %v197_v17  ;;  %v358_v15 = vld [vmem:[%s1140_s3 + $0x20] sm:$0xff]  ;;  %v356_v16 = vld [vmem:[%s1140_s3 + $0x10] sm:$0xff]  ;;  %v355_v17 = vld [vmem:[%s1140_s3 + $0x8] sm:$0xff] }
 0x10b   :  { %v138_v20 = vpop.xlane.xlu1 %137  ;;  %v152_v21 = vpop.xlane.xlu0 %151 }
 0x10c   :  { %v167_v22 = vmul.f32 0.0078125, %v138_v20  ;;  %v174_v23 = vmul.f32 0.0078125, %v152_v21  ;;  %v198_v24 = vmul.f32 %v954_v18, %v954_v18  ;;  %v205_v25 = vmul.f32 %v957_v19, %v957_v19  ;;  %v354_v20 = vld [vmem:[%s1140_s3] sm:$0xff] }
 0x10e   :  { %v964_v26 = vsub.f32 %v868_v38, %v167_v22  ;;  %v967_v27 = vsub.f32 %v862_v34, %v174_v23  ;;  %216 = vadd.xlane.f32.xlu1 %v198_v24  ;;  %230 = vadd.xlane.f32.xlu0 %v205_v25  ;;  %v366_v34 = vld [vmem:[%s1140_s3 + $0x60] sm:$0xff] }
 0x10f   :  { %v140_v28 = vpop.xlane.xlu1 %139  ;;  %v154_v29 = vpop.xlane.xlu0 %153  ;;  %587 = vmatprep.subr.mxu0 %v366_v34  ;;  %640 = vmatprep.subr.mxu1 %v366_v34 }
 0x110   :  { %v168_v31 = vmul.f32 0.0078125, %v140_v28  ;;  %v175_v32 = vmul.f32 0.0078125, %v154_v29  ;;  %v199_v33 = vmul.f32 %v964_v26, %v964_v26  ;;  %v206_v35 = vmul.f32 %v967_v27, %v967_v27  ;;  %588 = vmatpush3.msra.mxu0 %v366_v34  ;;  %656 = vmatpush3.msra.mxu1 %v366_v34 }
 0x112   :  { %v980_v36 = vsub.f32 %v882_v44, %v168_v31  ;;  %v983_v37 = vsub.f32 %v876_v40, %v175_v32  ;;  %218 = vadd.xlane.f32.xlu1 %v199_v33  ;;  %232 = vadd.xlane.f32.xlu0 %v206_v35  ;;  %v365_v40 = vld [vmem:[%s1140_s3 + $0x58] sm:$0xff] }
 0x113   :  { %v142_v38 = vpop.xlane.xlu1 %141  ;;  %v156_v39 = vpop.xlane.xlu0 %155  ;;  %589 = vmatprep.subr.mxu0 %v365_v40  ;;  %641 = vmatprep.subr.mxu1 %v365_v40 }
 0x114   :  { %v169_v41 = vmul.f32 0.0078125, %v142_v38  ;;  %v176_v42 = vmul.f32 0.0078125, %v156_v39  ;;  %v200_v43 = vmul.f32 %v980_v36, %v980_v36  ;;  %v207_v45 = vmul.f32 %v983_v37, %v983_v37  ;;  %590 = vmatpush3.msra.mxu0 %v365_v40  ;;  %657 = vmatpush3.msra.mxu1 %v365_v40 }
 0x115   :  { %591 = vmatprep.subr.mxu0 %v364_v48  ;;  %642 = vmatprep.subr.mxu1 %v364_v48 }
 0x116   :  { %v993_v44 = vsub.f32 %v896_v50, %v169_v41  ;;  %v996_v47 = vsub.f32 %v890_v46, %v176_v42  ;;  %220 = vadd.xlane.f32.xlu1 %v200_v43  ;;  %234 = vadd.xlane.f32.xlu0 %v207_v45  ;;  %v363_v46 = vld [vmem:[%s1140_s3 + $0x48] sm:$0xff] }
 0x117   :  { %v144_v49 = vpop.xlane.xlu1 %143  ;;  %v158_v51 = vpop.xlane.xlu0 %157  ;;  %592 = vmatpush3.msra.mxu0 %v364_v48  ;;  %658 = vmatpush3.msra.mxu1 %v364_v48 }
 0x118   :  { %v170_v53 = vmul.f32 0.0078125, %v144_v49  ;;  %v177_v54 = vmul.f32 0.0078125, %v158_v51  ;;  %v201_v55 = vmul.f32 %v993_v44, %v993_v44  ;;  %v208_v50 = vmul.f32 %v996_v47, %v996_v47  ;;  %593 = vmatprep.subr.mxu0 %v363_v46  ;;  %643 = vmatprep.subr.mxu1 %v363_v46 }
 0x119   :  { %594 = vmatpush3.msra.mxu0 %v363_v46  ;;  %659 = vmatpush3.msra.mxu1 %v363_v46 }
 0x11a   :  { %v1009_v57 = vsub.f32 %v910_v56, %v170_v53  ;;  %v1012_v59 = vsub.f32 %v904_v52, %v177_v54  ;;  %222 = vadd.xlane.f32.xlu1 %v201_v55  ;;  %236 = vadd.xlane.f32.xlu0 %v208_v50  ;;  %v361_v52 = vld [vmem:[%s1140_s3 + $0x38] sm:$0xff]  ;;  %v1063_v50 = vld [vmem:[%s1138_s1] ss:$0 sm:$0xff]  ;;  %s728_s1 = smov [#allocation2]  }
 0x11b   :  { %v146_v61 = vpop.xlane.xlu1 %145  ;;  %v160_v0 = vpop.xlane.xlu0 %159  ;;  %595 = vmatprep.subr.mxu0 %v362_v60  ;;  %644 = vmatprep.subr.mxu1 %v362_v60 }
 0x11c   :  { %v171_v1 = vmul.f32 0.0078125, %v146_v61  ;;  %v178_v2 = vmul.f32 0.0078125, %v160_v0  ;;  %v202_v3 = vmul.f32 %v1009_v57, %v1009_v57  ;;  %v209_v56 = vmul.f32 %v1012_v59, %v1012_v59  ;;  %596 = vmatpush3.msra.mxu0 %v362_v60  ;;  %660 = vmatpush3.msra.mxu1 %v362_v60 }
 0x11d   :  { %597 = vmatprep.subr.mxu0 %v361_v52  ;;  %645 = vmatprep.subr.mxu1 %v361_v52 }
 0x11e   :  { %v1025_v5 = vsub.f32 %v924_v62, %v171_v1  ;;  %v1028_v6 = vsub.f32 %v918_v58, %v178_v2  ;;  %224 = vadd.xlane.f32.xlu1 %v202_v3  ;;  %238 = vadd.xlane.f32.xlu0 %v209_v56  ;;  %v360_v62 = vld [vmem:[%s1140_s3 + $0x30] sm:$0xff]  ;;  %v1069_v2 = vld [vmem:[%s1139_s2] ss:$0 sm:$0xff]  ;;  %s536_s2 = sshll.u32 %s728_s1, 4  ;;  %s537_s2 = int_to_ptr.vmem [resolvable:$true] %s536_s2 }
 0x11f   :  { %v162_v7 = vpop.xlane.xlu0 %161  ;;  %598 = vmatpush3.msra.mxu0 %v361_v52  ;;  %661 = vmatpush3.msra.mxu1 %v361_v52  ;;  %s705_s9 = scalar_lea.vmem %s537_s2, 2048  ;;  %p710_p1 = scmp.lt.s32.totalorder %s537_s2, %s537_s2 }
 0x120   :  { %v179_v8 = vmul.f32 0.0078125, %v162_v7  ;;  %v203_v9 = vmul.f32 %v1025_v5, %v1025_v5  ;;  %v210_v12 = vmul.f32 %v1028_v6, %v1028_v6  ;;  %599 = vmatprep.subr.mxu0 %v360_v62  ;;  %646 = vmatprep.subr.mxu1 %v360_v62  ;;  %p706_p0 = scmp.ne.s32.totalorder %s537_s2, %s705_s9  ;;  %p711_p2 = scmp.lt.s32.totalorder %s705_s9, %s705_s9 }
 0x121   :  { %600 = vmatpush3.msra.mxu0 %v360_v62  ;;  %662 = vmatpush3.msra.mxu1 %v360_v62 }
 0x122   :  { %v1038_v58 = vsub.f32 %v929_v63, %v179_v8  ;;  %226 = vadd.xlane.f32.xlu1 %v203_v9  ;;  %240 = vadd.xlane.f32.xlu0 %v210_v12  ;;  %v357_v63 = vld [vmem:[%s1140_s3 + $0x18] sm:$0xff]  ;;  %p712_p3 = por %p711_p2, %p710_p1 }
 0x123   :  { %601 = vmatprep.subr.mxu0 %v359_v13  ;;  %647 = vmatprep.subr.mxu1 %v359_v13 }
 0x124   :  { %v211_v14 = vmul.f32 %v1038_v58, %v1038_v58  ;;  %602 = vmatpush3.msra.mxu0 %v359_v13  ;;  %663 = vmatpush3.msra.mxu1 %v359_v13  ;;  %p713_p4 = pnand %p712_p3, %p706_p0 }
 0x125   :  { %603 = vmatprep.subr.mxu0 %v358_v15  ;;  %648 = vmatprep.subr.mxu1 %v358_v15 }
 0x126   :  { %242 = vadd.xlane.f32.xlu0 %v211_v14  ;;  %604 = vmatpush3.msra.mxu0 %v358_v15 }
 0x127   :  { %605 = vmatprep.subr.mxu0 %v357_v63  ;;  %664 = vmatpush3.msra.mxu1 %v358_v15 }
 0x128   :  { %606 = vmatpush3.msra.mxu0 %v357_v63  ;;  %649 = vmatprep.subr.mxu1 %v357_v63 }
 0x129   :  { %607 = vmatprep.subr.mxu0 %v356_v16  ;;  %665 = vmatpush3.msra.mxu1 %v357_v63 }
 0x12a   :  { %608 = vmatpush3.msra.mxu0 %v356_v16  ;;  %650 = vmatprep.subr.mxu1 %v356_v16 }
 0x12b   :  { %609 = vmatprep.subr.mxu0 %v355_v17  ;;  %666 = vmatpush3.msra.mxu1 %v356_v16 }
 0x12c   :  { %610 = vmatpush3.msra.mxu0 %v355_v17  ;;  %651 = vmatprep.subr.mxu1 %v355_v17 }
 0x12d   :  { %611 = vmatprep.subr.mxu0 %v354_v20  ;;  %667 = vmatpush3.msra.mxu1 %v355_v17 }
 0x12e   :  { %612 = vmatpush3.msra.mxu0 %v354_v20  ;;  %652 = vmatprep.subr.mxu1 %v354_v20 }
 0x12f   :  { %668 = vmatpush3.msra.mxu1 %v354_v20 }
 0x18f   :  { %v213_v21 = vpop.xlane.xlu1 %212 }
 0x190   :  { %v244_v22 = vmul.f32 0.0078125, %v213_v21 }
 0x192   :  { %v260_v23 = vadd.f32 1e-05, %v244_v22 }
 0x193   :  { %v215_v24 = vpop.xlane.xlu1 %214  ;;  %v229_v25 = vpop.xlane.xlu0 %228 }
 0x194   :  { %673 = vrsqrt.f32 %v260_v23  ;;  %v245_v28 = vmul.f32 0.0078125, %v215_v24  ;;  %v252_v29 = vmul.f32 0.0078125, %v229_v25 }
 0x196   :  { %v261_v30 = vadd.f32 1e-05, %v245_v28  ;;  %v268_v31 = vadd.f32 1e-05, %v252_v29 }
 0x197   :  { %v217_v32 = vpop.xlane.xlu1 %216  ;;  %v231_v33 = vpop.xlane.xlu0 %230 }
 0x198   :  { %675 = vrsqrt.f32 %v261_v30  ;;  %v246_v35 = vmul.f32 0.0078125, %v217_v32  ;;  %v253_v34 = vmul.f32 0.0078125, %v231_v33 }
 0x199   :  { %677 = vrsqrt.f32 %v268_v31 }
 0x19a   :  { %v262_v38 = vadd.f32 1e-05, %v246_v35  ;;  %v269_v39 = vadd.f32 1e-05, %v253_v34 }
 0x19b   :  { %v219_v41 = vpop.xlane.xlu1 %218  ;;  %v233_v42 = vpop.xlane.xlu0 %232 }
 0x19c   :  { %679 = vrsqrt.f32 %v262_v38  ;;  %v247_v43 = vmul.f32 0.0078125, %v219_v41  ;;  %v254_v45 = vmul.f32 0.0078125, %v233_v42 }
 0x19d   :  { %681 = vrsqrt.f32 %v269_v39 }
 0x19e   :  { %v263_v40 = vadd.f32 1e-05, %v247_v43  ;;  %v270_v48 = vadd.f32 1e-05, %v254_v45 }
 0x19f   :  { %v221_v49 = vpop.xlane.xlu1 %220  ;;  %v235_v51 = vpop.xlane.xlu0 %234 }
 0x1a0   :  { %683 = vrsqrt.f32 %v263_v40  ;;  %v248_v53 = vmul.f32 0.0078125, %v221_v49  ;;  %v255_v54 = vmul.f32 0.0078125, %v235_v51 }
 0x1a1   :  { %v674_v55 = vpop.eup %673  ;;  %685 = vrsqrt.f32 %v270_v48 }
 0x1a2   :  { %v264_v46 = vadd.f32 1e-05, %v248_v53  ;;  %v271_v60 = vadd.f32 1e-05, %v255_v54  ;;  %v292_v61 = vmul.f32 %v674_v55, %v939_v4 }
 0x1a3   :  { %v223_v0 = vpop.xlane.xlu1 %222  ;;  %v237_v1 = vpop.xlane.xlu0 %236 }
 0x1a4   :  { %687 = vrsqrt.f32 %v264_v46  ;;  %v249_v3 = vmul.f32 0.0078125, %v223_v0  ;;  %v256_v56 = vmul.f32 0.0078125, %v237_v1  ;;  %v315_v52 = vmul.f32 %v1063_v50, %v292_v61 }
 0x1a5   :  { %v676_v7 = vpop.eup %675  ;;  %689 = vrsqrt.f32 %v271_v60 }
 0x1a6   :  { %v678_v8 = vpop.eup %677  ;;  %v265_v9 = vadd.f32 1e-05, %v249_v3  ;;  %v272_v12 = vadd.f32 1e-05, %v256_v56  ;;  %v338_v62 = vadd.f32 %v1069_v2, %v315_v52  ;;  %v293_v4 = vmul.f32 %v676_v7, %v947_v11 }
 0x1a7   :  { %v225_v13 = vpop.xlane.xlu1 %224  ;;  %v239_v14 = vpop.xlane.xlu0 %238  ;;  %v300_v15 = vmul.f32 %v678_v8, %v944_v10 }
 0x1a8   :  { %691 = vrsqrt.f32 %v265_v9  ;;  %v250_v63 = vmul.f32 0.0078125, %v225_v13  ;;  %v257_v16 = vmul.f32 0.0078125, %v239_v14  ;;  %613 = vmatprep.mubr.f32.mxu0 %v338_v62  ;;  %v316_v17 = vmul.f32 %v1063_v50, %v293_v4 }
 0x1a9   :  { %v680_v20 = vpop.eup %679  ;;  %693 = vrsqrt.f32 %v272_v12  ;;  %v323_v21 = vmul.f32 %v1063_v50, %v300_v15 }
 0x1aa   :  { %v682_v22 = vpop.eup %681  ;;  %v266_v23 = vadd.f32 1e-05, %v250_v63  ;;  %v273_v24 = vadd.f32 1e-05, %v257_v16  ;;  %v339_v25 = vadd.f32 %v1069_v2, %v316_v17  ;;  %v294_v11 = vmul.f32 %v680_v20, %v954_v18 }
 0x1ab   :  { %v227_v28 = vpop.xlane.xlu1 %226  ;;  %v241_v29 = vpop.xlane.xlu0 %240  ;;  %v346_v10 = vadd.f32 %v1069_v2, %v323_v21  ;;  %v301_v30 = vmul.f32 %v682_v22, %v957_v19 }
 0x1ac   :  { %695 = vrsqrt.f32 %v266_v23  ;;  %v251_v31 = vmul.f32 0.0078125, %v227_v28  ;;  %v258_v32 = vmul.f32 0.0078125, %v241_v29  ;;  %614 = vmatmul.mubr.f32.vlgmr.msra.gmra.mxu0 %v339_v25  ;;  %v317_v33 = vmul.f32 %v1063_v50, %v294_v11 }
 0x1ad   :  { %v684_v35 = vpop.eup %683  ;;  %697 = vrsqrt.f32 %v273_v24  ;;  %625 = vmatprep.mubr.f32.mxu1 %v346_v10  ;;  %v324_v34 = vmul.f32 %v1063_v50, %v301_v30 }
 0x1ae   :  { %v686_v38 = vpop.eup %685  ;;  %v267_v39 = vadd.f32 1e-05, %v251_v31  ;;  %v274_v18 = vadd.f32 1e-05, %v258_v32  ;;  %v340_v41 = vadd.f32 %v1069_v2, %v317_v33  ;;  %v295_v42 = vmul.f32 %v684_v35, %v964_v26 }
 0x1af   :  { %v243_v43 = vpop.xlane.xlu0 %242  ;;  %v347_v19 = vadd.f32 %v1069_v2, %v324_v34  ;;  %v302_v45 = vmul.f32 %v686_v38, %v967_v27 }
 0x1b0   :  { %699 = vrsqrt.f32 %v267_v39  ;;  %v259_v40 = vmul.f32 0.0078125, %v243_v43  ;;  %616 = vmatprep.mubr.f32.mxu0 %v340_v41  ;;  %v318_v48 = vmul.f32 %v1063_v50, %v295_v42 }
 0x1b1   :  { %v688_v49 = vpop.eup %687  ;;  %701 = vrsqrt.f32 %v274_v18  ;;  %626 = vmatmul.mubr.f32.vlgmr.msra.gmra.mxu1 %v347_v19  ;;  %v325_v51 = vmul.f32 %v1063_v50, %v302_v45 }
 0x1b2   :  { %v690_v53 = vpop.eup %689  ;;  %v275_v54 = vadd.f32 1e-05, %v259_v40  ;;  %v341_v55 = vadd.f32 %v1069_v2, %v318_v48  ;;  %v296_v26 = vmul.f32 %v688_v49, %v980_v36 }
 0x1b3   :  { %v348_v46 = vadd.f32 %v1069_v2, %v325_v51  ;;  %v303_v27 = vmul.f32 %v690_v53, %v983_v37 }
 0x1b4   :  { %703 = vrsqrt.f32 %v275_v54  ;;  %617 = vmatmul.mubr.f32.gmra.mxu0 %v341_v55  ;;  %v319_v60 = vmul.f32 %v1063_v50, %v296_v26 }
 0x1b5   :  { %v692_v61 = vpop.eup %691  ;;  %628 = vmatprep.mubr.f32.mxu1 %v348_v46  ;;  %v326_v0 = vmul.f32 %v1063_v50, %v303_v27 }
 0x1b6   :  { %v694_v1 = vpop.eup %693  ;;  %v342_v3 = vadd.f32 %v1069_v2, %v319_v60  ;;  %v297_v56 = vmul.f32 %v692_v61, %v993_v44 }
 0x1b7   :  { %v349_v52 = vadd.f32 %v1069_v2, %v326_v0  ;;  %v304_v36 = vmul.f32 %v694_v1, %v996_v47 }
 0x1b8   :  { %619 = vmatprep.mubr.f32.mxu0 %v342_v3  ;;  %v320_v37 = vmul.f32 %v1063_v50, %v297_v56 }
 0x1b9   :  { %v696_v7 = vpop.eup %695  ;;  %629 = vmatmul.mubr.f32.gmra.mxu1 %v349_v52  ;;  %v327_v8 = vmul.f32 %v1063_v50, %v304_v36 }
 0x1ba   :  { %v698_v9 = vpop.eup %697  ;;  %v343_v12 = vadd.f32 %v1069_v2, %v320_v37  ;;  %v298_v62 = vmul.f32 %v696_v7, %v1009_v57 }
 0x1bb   :  { %v350_v4 = vadd.f32 %v1069_v2, %v327_v8  ;;  %v305_v44 = vmul.f32 %v698_v9, %v1012_v59 }
 0x1bc   :  { %620 = vmatmul.mubr.f32.gmra.mxu0 %v343_v12  ;;  %v321_v13 = vmul.f32 %v1063_v50, %v298_v62 }
 0x1bd   :  { %v700_v47 = vpop.eup %699  ;;  %631 = vmatprep.mubr.f32.mxu1 %v350_v4  ;;  %v328_v14 = vmul.f32 %v1063_v50, %v305_v44 }
 0x1be   :  { %v702_v15 = vpop.eup %701  ;;  %v344_v63 = vadd.f32 %v1069_v2, %v321_v13  ;;  %v299_v16 = vmul.f32 %v700_v47, %v1025_v5 }
 0x1bf   :  { %v351_v17 = vadd.f32 %v1069_v2, %v328_v14  ;;  %v306_v57 = vmul.f32 %v702_v15, %v1028_v6 }
 0x1c0   :  { %622 = vmatprep.mubr.f32.mxu0 %v344_v63  ;;  %v322_v20 = vmul.f32 %v1063_v50, %v299_v16 }
 0x1c1   :  { %v704_v59 = vpop.eup %703  ;;  %632 = vmatmul.mubr.f32.gmra.mxu1 %v351_v17  ;;  %v329_v21 = vmul.f32 %v1063_v50, %v306_v57 }
 0x1c2   :  { %v345_v22 = vadd.f32 %v1069_v2, %v322_v20  ;;  %v307_v23 = vmul.f32 %v704_v59, %v1038_v58 }
 0x1c3   :  { %v352_v24 = vadd.f32 %v1069_v2, %v329_v21 }
 0x1c4   :  { %623 = vmatmul.mubr.f32.gmra.mxu0 %v345_v22  ;;  %v330_v5 = vmul.f32 %v1063_v50, %v307_v23 }
 0x1c5   :  { %634 = vmatprep.mubr.f32.mxu1 %v352_v24 }
 0x1c6   :  { %v353_v25 = vadd.f32 %v1069_v2, %v330_v5 }
 0x1c8   :  { %635 = vmatmul.mubr.f32.gmra.mxu1 %v353_v25 }
 0x26c   :  { %v615_v6 = vpop.f32.mrf.mxu0 }
 0x26d   :  { %516 = vst.msk [vmem:[#allocation2 + $0x8] sm:$0xff] %vm114_vm0, %v615_v6 }
 0x26e   :  { %v436_v11 = vpop.f32.mrf.mxu0 }
 0x26f   :  { %515 = vst.msk [vmem:[#allocation2] sm:$0xff] %vm114_vm0, %v436_v11 }
 0x271   :  { %v627_v28 = vpop.f32.mrf.mxu1 }
 0x272   :  { %524 = vst.msk [vmem:[#allocation2 + $0x48] sm:$0xff] %vm114_vm0, %v627_v28 }
 0x273   :  { %v476_v29 = vpop.f32.mrf.mxu1 }
 0x274   :  { %523 = vst.msk [vmem:[#allocation2 + $0x40] sm:$0xff] %vm114_vm0, %v476_v29  ;;  %v618_v58 = vpop.f32.mrf.mxu0 }
 0x275   :  { %518 = vst.msk [vmem:[#allocation2 + $0x18] sm:$0xff] %vm114_vm0, %v618_v58 }
 0x276   :  { %v446_v50 = vpop.f32.mrf.mxu0 }
 0x277   :  { %517 = vst.msk [vmem:[#allocation2 + $0x10] sm:$0xff] %vm114_vm0, %v446_v50 }
 0x279   :  { %v630_v2 = vpop.f32.mrf.mxu1 }
 0x27a   :  { %526 = vst.msk [vmem:[#allocation2 + $0x58] sm:$0xff] %vm114_vm0, %v630_v2 }
 0x27b   :  { %v486_v10 = vpop.f32.mrf.mxu1 }
 0x27c   :  { %525 = vst.msk [vmem:[#allocation2 + $0x50] sm:$0xff] %vm114_vm0, %v486_v10  ;;  %v621_v30 = vpop.f32.mrf.mxu0 }
 0x27d   :  { %520 = vst.msk [vmem:[#allocation2 + $0x28] sm:$0xff] %vm114_vm0, %v621_v30 }
 0x27e   :  { %v456_v31 = vpop.f32.mrf.mxu0 }
 0x27f   :  { %519 = vst.msk [vmem:[#allocation2 + $0x20] sm:$0xff] %vm114_vm0, %v456_v31 }
 0x281   :  { %v633_v32 = vpop.f32.mrf.mxu1 }
 0x282   :  { %528 = vst.msk [vmem:[#allocation2 + $0x68] sm:$0xff] %vm114_vm0, %v633_v32 }
 0x283   :  { %v496_v33 = vpop.f32.mrf.mxu1 }
 0x284   :  { %527 = vst.msk [vmem:[#allocation2 + $0x60] sm:$0xff] %vm114_vm0, %v496_v33  ;;  %v624_v35 = vpop.f32.mrf.mxu0 }
 0x285   :  { %522 = vst.msk [vmem:[#allocation2 + $0x38] sm:$0xff] %vm114_vm0, %v624_v35 }
 0x286   :  { %v466_v34 = vpop.f32.mrf.mxu0 }
 0x287   :  { %521 = vst.msk [vmem:[#allocation2 + $0x30] sm:$0xff] %vm114_vm0, %v466_v34 }
 0x288   :  { %v636_v38 = vpop.f32.mrf.mxu1 }
 0x289   :  { %530 = vst.msk [vmem:[#allocation2 + $0x78] sm:$0xff] %vm114_vm0, %v636_v38 }
 0x28a   :  { %v506_v39 = vpop.f32.mrf.mxu1 }
 0x28b   :  { %529 = vst.msk [vmem:[#allocation2 + $0x70] sm:$0xff] %vm114_vm0, %v506_v39 }
 0x28c   :  { %716 = shalt.err (!%p713_p4)
}
 0x28d   :  { %s729_s10 = smov 128   ;;  %s730_s11 = smov 8  }
 0x28e   :  { %542 = dma.vmem_to_hbm [thread:$0]  %s537_s2, 2048, %s1141_s4, [#allocation3], %s729_s10, %s729_s10, %s730_s11  }
 0x28f   :  { %725 = dma.done.wait [#allocation3], 2048  }
 0x290   :  { %726 = vsyncadd [#allocation3], 4294965248 }
 0x291   :  { %546 = vsyncpa [#allocation3], 1 }

</bundles_post_ra>
